<compile_context>
chip_gen: v7x
topology: tpu7x:2x2x1
jax: 0.10.0
libtpu: 0.0.40
codegen_flags: <defaults>
</compile_context>

<pallas_src>
import functools

import jax
import jax.numpy as jnp
from jax import lax
from jax.experimental import pallas as pl
from jax.experimental.pallas import tpu as pltpu


def _bce_kernel(*refs, f_total, tf, chunk, has_weight, ragged):
    if has_weight:
        x_ref, t_ref, cw_ref, o_ref, acc_ref = refs
    else:
        x_ref, t_ref, o_ref, acc_ref = refs
        cw_ref = None

    k = pl.program_id(1)
    nk = pl.num_programs(1)

    @pl.when(k == 0)
    def _():
        acc_ref[...] = jnp.zeros_like(acc_ref)

    n_chunks = tf // chunk
    n_sub = chunk // 128

    def chunk_body(c, acc, masked):
        off = pl.multiple_of(c * chunk, chunk)
        x = x_ref[:, pl.ds(off, chunk)].astype(jnp.float32)
        t = t_ref[:, pl.ds(off, chunk)].astype(jnp.float32)
        # Numerically stable BCE-with-logits (PyTorch's formulation):
        #   l = max(x, 0) - x * t + log1p(exp(-|x|))
        l = jnp.maximum(x, 0.0) - x * t + jnp.log1p(jnp.exp(-jnp.abs(x)))
        if has_weight:
            # (1, chunk) per-class weight broadcast over the batch tile.
            l = l * cw_ref[:, pl.ds(off, chunk)].astype(jnp.float32)
        if masked:
            # Cheap (1, chunk) iota vs. the scalar feature extent; only the
            # last feature tile ever takes this path (see pl.when below).
            col = jax.lax.broadcasted_iota(jnp.int32, (1, chunk), 1) + (k * tf + off)
            l = jnp.where(col < f_total, l, 0.0)
        # Lane-wise partial accumulation into the (bt, 128) accumulator.
        for s in range(n_sub):
            acc = acc + l[:, s * 128:(s + 1) * 128]
        return acc

    def accumulate(masked):
        acc = lax.fori_loop(
            0, n_chunks,
            lambda c, a: chunk_body(c, a, masked),
            acc_ref[...],
            unroll=True,
        )
        acc_ref[...] = acc

    if ragged:
        # Only the last feature tile needs the ragged-lane mask.
        @pl.when(k < nk - 1)
        def _():
            accumulate(False)

        @pl.when(k == nk - 1)
        def _():
            accumulate(True)
    else:
        accumulate(False)

    @pl.when(k == nk - 1)
    def _():
        # Single cross-lane reduce per batch tile, only at finalize.
        o_ref[...] = jnp.sum(acc_ref[...], axis=1, keepdims=True)


def _pick_defaults():
    """Per-generation tile defaults: bigger tiles where VMEM allows it."""
    try:
        info = pltpu.get_tpu_info()
        vmem = getattr(info, "vmem_capacity_bytes", None)
    except Exception:  # pragma: no cover - conservative fallback off-TPU
        vmem = None
    if vmem is not None and vmem >= (96 << 20):
        # v5e / v6e class (128 MiB physical VMEM): ~4 MiB per buffer, grow tf
        # (not bt) so the single vst slot on v5e isn't stressed.
        return 4096, 256, 64 << 20
    # v7x class (64 MiB physical) or unknown: safe ~2 MiB per buffer.
    return 2048, 256, 32 << 20


def bce_loss(input, target, weight=None, sample_weight=None, reduction="mean",
             tile_f=None, tile_b=None):
    """Pallas BCELoss matching the unitorch module semantics.

    input : (B, C) logits.  target : (B, C) or (B,) float labels.
    weight: optional (C,) per-class weight.  sample_weight: optional (B,).
    Returns a scalar if reduction == 'mean', else the (B,) per-sample loss.
    """
    if target.ndim == 1:
        target = target[:, None]
    assert input.ndim == 2 and target.ndim == 2
    assert target.shape == input.shape
    B, F = input.shape

    def rup(v, m):
        return ((v + m - 1) // m) * m

    def_tf, def_bt, vmem_limit = _pick_defaults()
    tile_f = def_tf if tile_f is None else tile_f
    tile_b = def_bt if tile_b is None else tile_b

    # Lane/sublane-aligned tiles, bounded by the per-generation VMEM budget.
    tf = min(rup(max(tile_f, 128), 128), rup(F, 128))
    bt = min(rup(max(tile_b, 8), 8), rup(B, 8))

    # Keep >= 2 batch tiles when the batch allows it so the "parallel" axis
    # can shard across the two TensorCores on v7x (harmless on v5e/v6e).
    if pl.cdiv(B, bt) < 2 and B > 8:
        bt = rup(pl.cdiv(B, 2), 8)

    # Lane-chunk width for the fused compute loop (256-512 lanes, divides tf).
    chunk = 512
    while chunk > 128 and tf % chunk != 0:
        chunk //= 2

    grid = (pl.cdiv(B, bt), pl.cdiv(F, tf))
    ragged = (F % tf) != 0

    in_specs = [
        pl.BlockSpec((bt, tf), lambda b, k: (b, k)),
        pl.BlockSpec((bt, tf), lambda b, k: (b, k)),
    ]
    args = [input, target]
    has_weight = weight is not None
    if has_weight:
        args.append(jnp.asarray(weight).reshape(1, F))
        in_specs.append(pl.BlockSpec((1, tf), lambda b, k: (0, k)))

    kernel = functools.partial(
        _bce_kernel, f_total=F, tf=tf, chunk=chunk,
        has_weight=has_weight, ragged=ragged)

    per_sample = pl.pallas_call(
        kernel,
        out_shape=jax.ShapeDtypeStruct((B, 1), jnp.float32),
        grid_spec=pltpu.PrefetchScalarGridSpec(
            num_scalar_prefetch=0,
            grid=grid,
            in_specs=in_specs,
            out_specs=pl.BlockSpec((bt, 1), lambda b, k: (b, 0)),
            scratch_shapes=[pltpu.VMEM((bt, 128), jnp.float32)],
        ),
        compiler_params=pltpu.CompilerParams(
            dimension_semantics=("parallel", "arbitrary"),
            vmem_limit_bytes=vmem_limit,
        ),
    )(*args)

    # Trivial O(B) epilogue kept in the wrapper (keeps the kernel batch-
    # tileable and the output lane-layout simple).
    loss = per_sample[:, 0]
    if sample_weight is not None:
        loss = loss * sample_weight.reshape(B).astype(loss.dtype)
    if reduction == "mean":
        loss = jnp.mean(loss)
    return loss


def _ref_bce(x, t, weight=None, sample_weight=None, reduction="mean"):
    x = x.astype(jnp.float32)
    t = t.astype(jnp.float32)
    l = jnp.maximum(x, 0.0) - x * t + jnp.log1p(jnp.exp(-jnp.abs(x)))
    if weight is not None:
        l = l * weight.reshape(1, -1).astype(jnp.float32)
    per = jnp.sum(l, axis=1)
    if sample_weight is not None:
        per = per * sample_weight
    if reduction == "mean":
        return jnp.mean(per)
    return per


if __name__ == "__main__":
    key = jax.random.PRNGKey(0)
    k1, k2, k3, k4, k5, k6 = jax.random.split(key, 6)

    # Module spec: 2-D (batch, num_classes) logits and float targets.
    B, C = 2, 32
    x = jax.random.normal(k1, (B, C), dtype=jnp.float32)
    t = (jax.random.uniform(k2, (B, C)) > 0.5).astype(jnp.float32)
    sw = jax.random.uniform(k3, (B,), dtype=jnp.float32)
    cw = jax.random.uniform(k4, (C,), dtype=jnp.float32) + 0.5

    # reduction='mean' with class weight and sample_weight.
    out = bce_loss(x, t, weight=cw, sample_weight=sw, reduction="mean")
    jax.block_until_ready(out)
    ref = _ref_bce(x, t, weight=cw, sample_weight=sw, reduction="mean")
    assert jnp.allclose(out, ref, rtol=1e-5, atol=1e-5), (out, ref)

    # reduction='none' path: per-sample sums, no weights.
    out_n = bce_loss(x, t, reduction="none")
    jax.block_until_ready(out_n)
    ref_n = _ref_bce(x, t, reduction="none")
    assert jnp.allclose(out_n, ref_n, rtol=1e-5, atol=1e-5)

    # Multi-tile / ragged path: B, F not multiples of the forced small tiles.
    B2, F2 = 10, 300
    x2 = jax.random.normal(k5, (B2, F2), dtype=jnp.float32)
    t2 = (jax.random.uniform(k6, (B2, F2)) > 0.5).astype(jnp.float32)
    out2 = bce_loss(x2, t2, reduction="mean", tile_f=128, tile_b=8)
    jax.block_until_ready(out2)
    ref2 = _ref_bce(x2, t2, reduction="mean")
    assert jnp.allclose(out2, ref2, rtol=1e-5, atol=1e-5), (out2, ref2)

    # Default (per-chip) tile selection on the same ragged shapes.
    out2b = bce_loss(x2, t2, weight=None, sample_weight=None, reduction="mean")
    jax.block_until_ready(out2b)
    assert jnp.allclose(out2b, ref2, rtol=1e-5, atol=1e-5), (out2b, ref2)

    # 1-D target path (module unsqueezes to (B, 1)).
    x3 = jax.random.normal(k1, (B, 1), dtype=jnp.float32)
    t3 = (jax.random.uniform(k2, (B,)) > 0.5).astype(jnp.float32)
    out3 = bce_loss(x3, t3, reduction="mean")
    jax.block_until_ready(out3)
    ref3 = _ref_bce(x3, t3.reshape(B, 1), reduction="mean")
    assert jnp.allclose(out3, ref3, rtol=1e-5, atol=1e-5), (out3, ref3)

    print("KERNEL_OK")
</pallas_src>

<mosaic_0001>
module attributes {stable_mosaic.version = 11 : i64} {
  func.func @_bce_kernel(%arg0: i32, %arg1: i32, %arg2: memref<8x128xf32, #tpu.memory_space<vmem>>, %arg3: memref<8x128xf32, #tpu.memory_space<vmem>>, %arg4: memref<1x128xf32, #tpu.memory_space<vmem>>, %arg5: memref<8x1xf32, #tpu.memory_space<vmem>>, %arg6: memref<8x128xf32, #tpu.memory_space<vmem>>) attributes {dimension_semantics = [#tpu.dimension_semantics<parallel>, #tpu.dimension_semantics<arbitrary>], iteration_bounds = array<i64: 1, 1>, scalar_prefetch = 0 : i64, scratch_operands = 1 : i64, tpu.core_type = #tpu.core_type<tc>, window_params = [{transform_indices = @transform_0, window_bounds = array<i64: 8, 128>}, {transform_indices = @transform_1, window_bounds = array<i64: 8, 128>}, {transform_indices = @transform_2, window_bounds = array<i64: 1, 128>}, {transform_indices = @transform_3, window_bounds = array<i64: 8, 1>}]} {
    %c0_i32 = arith.constant 0 : i32
    %0 = arith.cmpi eq, %arg1, %c0_i32 : i32
    %1 = arith.extui %0 : i1 to i32
    %c0_i32_0 = arith.constant 0 : i32
    %2 = arith.cmpi ne, %1, %c0_i32_0 : i32
    scf.if %2 {
      %cst = arith.constant 0.000000e+00 : f32
      %12 = vector.broadcast %cst : f32 to vector<8x128xf32>
      %c0 = arith.constant 0 : index
      %c0_7 = arith.constant 0 : index
      %13 = vector.load %arg6[%c0, %c0_7] : memref<8x128xf32, #tpu.memory_space<vmem>>, vector<8x128xf32>
      tpu.vector_store %arg6[%c0, %c0_7], %12 {strides = array<i32>} : memref<8x128xf32, #tpu.memory_space<vmem>>, vector<8x128xf32>,
    } else {
    }
    %c0_i32_1 = arith.constant 0 : i32
    %3 = arith.cmpi slt, %arg1, %c0_i32_1 : i32
    %4 = arith.extui %3 : i1 to i32
    %c0_i32_2 = arith.constant 0 : i32
    %5 = arith.cmpi ne, %4, %c0_i32_2 : i32
    scf.if %5 {
      %c0 = arith.constant 0 : index
      %c0_7 = arith.constant 0 : index
      %12 = vector.load %arg6[%c0, %c0_7] : memref<8x128xf32, #tpu.memory_space<vmem>>, vector<8x128xf32>
      %c0_i32_8 = arith.constant 0 : i32
      %c128_i32 = arith.constant 128 : i32
      %13 = arith.muli %c0_i32_8, %c128_i32 : i32
      %14 = tpu.assume_multiple %13, 128 : i32
      %c0_9 = arith.constant 0 : index
      %15 = arith.index_cast %14 : i32 to index
      %16 = vector.load %arg2[%c0_9, %15] : memref<8x128xf32, #tpu.memory_space<vmem>>, vector<8x128xf32>
      %c0_10 = arith.constant 0 : index
      %17 = arith.index_cast %14 : i32 to index
      %18 = vector.load %arg3[%c0_10, %17] : memref<8x128xf32, #tpu.memory_space<vmem>>, vector<8x128xf32>
      %cst = arith.constant 0.000000e+00 : f32
      %19 = vector.broadcast %cst : f32 to vector<8x128xf32>
      %20 = arith.maximumf %16, %19 : vector<8x128xf32>
      %21 = arith.mulf %16, %18 : vector<8x128xf32>
      %22 = arith.subf %20, %21 : vector<8x128xf32>
      %23 = math.absf %16 : vector<8x128xf32>
      %cst_11 = arith.constant 0.000000e+00 : f32
      %24 = vector.broadcast %cst_11 : f32 to vector<8x128xf32>
      %25 = arith.subf %24, %23 : vector<8x128xf32>
      %26 = math.exp %25 : vector<8x128xf32>
      %27 = math.log1p %26 : vector<8x128xf32>
      %28 = arith.addf %22, %27 : vector<8x128xf32>
      %c0_12 = arith.constant 0 : index
      %29 = arith.index_cast %14 : i32 to index
      %30 = vector.load %arg4[%c0_12, %29] : memref<1x128xf32, #tpu.memory_space<vmem>>, vector<1x128xf32>
      %31 = vector.broadcast %30 : vector<1x128xf32> to vector<8x128xf32>
      %32 = arith.mulf %28, %31 : vector<8x128xf32>
      %33 = arith.addf %12, %32 : vector<8x128xf32>
      %c1_i32 = arith.constant 1 : i32
      %c0_13 = arith.constant 0 : index
      %c0_14 = arith.constant 0 : index
      %34 = vector.load %arg6[%c0_13, %c0_14] : memref<8x128xf32, #tpu.memory_space<vmem>>, vector<8x128xf32>
      tpu.vector_store %arg6[%c0_13, %c0_14], %33 {strides = array<i32>} : memref<8x128xf32, #tpu.memory_space<vmem>>, vector<8x128xf32>,
    } else {
    }
    %c0_i32_3 = arith.constant 0 : i32
    %6 = arith.cmpi eq, %arg1, %c0_i32_3 : i32
    %7 = arith.extui %6 : i1 to i32
    %c0_i32_4 = arith.constant 0 : i32
    %8 = arith.cmpi ne, %7, %c0_i32_4 : i32
    scf.if %8 {
      %c0 = arith.constant 0 : index
      %c0_7 = arith.constant 0 : index
      %12 = vector.load %arg6[%c0, %c0_7] : memref<8x128xf32, #tpu.memory_space<vmem>>, vector<8x128xf32>
      %c0_i32_8 = arith.constant 0 : i32
      %c128_i32 = arith.constant 128 : i32
      %13 = arith.muli %c0_i32_8, %c128_i32 : i32
      %14 = tpu.assume_multiple %13, 128 : i32
      %c0_9 = arith.constant 0 : index
      %15 = arith.index_cast %14 : i32 to index
      %16 = vector.load %arg2[%c0_9, %15] : memref<8x128xf32, #tpu.memory_space<vmem>>, vector<8x128xf32>
      %c0_10 = arith.constant 0 : index
      %17 = arith.index_cast %14 : i32 to index
      %18 = vector.load %arg3[%c0_10, %17] : memref<8x128xf32, #tpu.memory_space<vmem>>, vector<8x128xf32>
      %cst = arith.constant 0.000000e+00 : f32
      %19 = vector.broadcast %cst : f32 to vector<8x128xf32>
      %20 = arith.maximumf %16, %19 : vector<8x128xf32>
      %21 = arith.mulf %16, %18 : vector<8x128xf32>
      %22 = arith.subf %20, %21 : vector<8x128xf32>
      %23 = math.absf %16 : vector<8x128xf32>
      %cst_11 = arith.constant 0.000000e+00 : f32
      %24 = vector.broadcast %cst_11 : f32 to vector<8x128xf32>
      %25 = arith.subf %24, %23 : vector<8x128xf32>
      %26 = math.exp %25 : vector<8x128xf32>
      %27 = math.log1p %26 : vector<8x128xf32>
      %28 = arith.addf %22, %27 : vector<8x128xf32>
      %c0_12 = arith.constant 0 : index
      %29 = arith.index_cast %14 : i32 to index
      %30 = vector.load %arg4[%c0_12, %29] : memref<1x128xf32, #tpu.memory_space<vmem>>, vector<1x128xf32>
      %31 = vector.broadcast %30 : vector<1x128xf32> to vector<8x128xf32>
      %32 = arith.mulf %28, %31 : vector<8x128xf32>
      %33 = tpu.iota {dimensions = array<i32: 1>} : vector<1x128xi32>
      %c128_i32_13 = arith.constant 128 : i32
      %34 = arith.muli %arg1, %c128_i32_13 : i32
      %35 = arith.addi %34, %14 : i32
      %36 = vector.broadcast %35 : i32 to vector<1x128xi32>
      %37 = arith.addi %33, %36 : vector<1x128xi32>
      %c32_i32 = arith.constant 32 : i32
      %38 = vector.broadcast %c32_i32 : i32 to vector<1x128xi32>
      %39 = arith.cmpi slt, %37, %38 : vector<1x128xi32>
      %cst_14 = arith.constant 0.000000e+00 : f32
      %40 = vector.shape_cast %39 : vector<1x128xi1> to vector<1x128xi1>
      %41 = vector.broadcast %40 : vector<1x128xi1> to vector<8x128xi1>
      %42 = vector.broadcast %cst_14 : f32 to vector<8x128xf32>
      %43 = arith.select %41, %32, %42 : vector<8x128xi1>, vector<8x128xf32>
      %44 = arith.addf %12, %43 : vector<8x128xf32>
      %c1_i32 = arith.constant 1 : i32
      %c0_15 = arith.constant 0 : index
      %c0_16 = arith.constant 0 : index
      %45 = vector.load %arg6[%c0_15, %c0_16] : memref<8x128xf32, #tpu.memory_space<vmem>>, vector<8x128xf32>
      tpu.vector_store %arg6[%c0_15, %c0_16], %44 {strides = array<i32>} : memref<8x128xf32, #tpu.memory_space<vmem>>, vector<8x128xf32>,
    } else {
    }
    %c0_i32_5 = arith.constant 0 : i32
    %9 = arith.cmpi eq, %arg1, %c0_i32_5 : i32
    %10 = arith.extui %9 : i1 to i32
    %c0_i32_6 = arith.constant 0 : i32
    %11 = arith.cmpi ne, %10, %c0_i32_6 : i32
    scf.if %11 {
      %c0 = arith.constant 0 : index
      %c0_7 = arith.constant 0 : index
      %12 = vector.load %arg6[%c0, %c0_7] : memref<8x128xf32, #tpu.memory_space<vmem>>, vector<8x128xf32>
      %cst = arith.constant dense<0.000000e+00> : vector<8xf32>
      %13 = vector.multi_reduction <add>, %12, %cst [1] : vector<8x128xf32> to vector<8xf32>
      %14 = vector.shape_cast %13 : vector<8xf32> to vector<8x1xf32>
      %c0_8 = arith.constant 0 : index
      %c0_9 = arith.constant 0 : index
      %15 = vector.load %arg5[%c0_8, %c0_9] : memref<8x1xf32, #tpu.memory_space<vmem>>, vector<8x1xf32>
      tpu.vector_store %arg5[%c0_8, %c0_9], %14 {strides = array<i32>} : memref<8x1xf32, #tpu.memory_space<vmem>>, vector<8x1xf32>,
    } else {
    }
    return
  }
  func.func @transform_0(%arg0: i32, %arg1: i32) -> (i32, i32) {
    %c0_i32 = arith.constant 0 : i32
    return %arg0, %arg1 : i32, i32
  }
  func.func @transform_1(%arg0: i32, %arg1: i32) -> (i32, i32) {
    %c0_i32 = arith.constant 0 : i32
    return %arg0, %arg1 : i32, i32
  }
  func.func @transform_2(%arg0: i32, %arg1: i32) -> (i32, i32) {
    %c0_i32 = arith.constant 0 : i32
    %c0_i32_0 = arith.constant 0 : i32
    return %c0_i32, %arg1 : i32, i32
  }
  func.func @transform_3(%arg0: i32, %arg1: i32) -> (i32, i32) {
    %c0_i32 = arith.constant 0 : i32
    %c0_i32_0 = arith.constant 0 : i32
    return %arg0, %c0_i32 : i32, i32
  }
}

</mosaic_0001>

<bundles_post_ra>
// kernel: tpu_custom_call.1
= control target key start
LH: loop header
LB: loop body
LE: loop exit
PB: predicated region body
PF: predicated region fallthrough
CT: control target
= control target key end

     0   :  { %8 = vsyncpa [#allocation4], 0  ;;  %s232_s0 = inlined_call_operand.hbm [shape: f32[2,32], index: 0, kind: input, shape index: {}]   ;;  %s233_s1 = inlined_call_operand.vmem [shape: f32[2,32], index: 1, kind: input, shape index: {}]   ;;  %s234_s2 = inlined_call_operand.vmem [shape: f32[1,32], index: 2, kind: input, shape index: {}]   ;;  %s235_s3 = inlined_call_operand.vmem [shape: f32[2,1], index: 3, kind: output, shape index: {}]  }
   0x1   :  { %13 = vsyncadd [#allocation4], 96  ;;  %s188_s12 = smov [#allocation3]   ;;  %s164_s16 = scalar_lea.hbm %s232_s0, 32 }
   0x2   :  { %s14_s13 = sshll.u32 %s188_s12, 4  ;;  %p165_p0 = scmp.ne.s32.totalorder %s232_s0, %s164_s16  ;;  %s15_s13 = int_to_ptr.vmem [resolvable:$true] %s14_s13 }
   0x3   :  { %p168_p1 = scmp.lt.u32.totalorder %s164_s16, %s232_s0 }
   0x5   :  { %p170_p2 = pnand %p168_p1, %p165_p0 }
   0x7   :  { %173 = shalt.err (!%p170_p2)
}
   0x8   :  { %s174_s21 = scalar_lea.vmem %s15_s13, 32  ;;  %s178_s22 = scalar_lea.vmem %s15_s13, 128 }
   0x9   :  { %p175_p3 = scmp.ne.s32.totalorder %s15_s13, %s174_s21  ;;  %p179_p4 = scmp.lt.s32.totalorder %s15_s13, %s15_s13 }
   0xa   :  { %p180_p5 = scmp.lt.s32.totalorder %s178_s22, %s174_s21 }
   0xc   :  { %p181_p6 = por %p180_p5, %p179_p4 }
   0xe   :  { %p182_p7 = pnand %p181_p6, %p175_p3 }
  0x10   :  { %185 = shalt.err (!%p182_p7)
}
  0x11   :  { %s189_s23 = smov 32   ;;  %s190_s24 = smov 2  }
  0x12   :  { %20 = dma.hbm_to_vmem [thread:$0]  %s232_s0, 32, %s15_s13, [#allocation4], %s189_s23, %s189_s23, %s190_s24  }
  0x13   :  { %186 = dma.done.wait [#allocation4], 128  }
  0x14   :  { %187 = vsyncadd [#allocation4], 4294967168  ;;  %v71_v0 = vld [vmem:[#allocation3] sm:$0xff]  ;;  %v98_v12 = vlaneseq  ;;  %vm113_vm2 = vcmask 7168  }
  0x15   :  { %v76_v1 = vand.u32 2147483647, %v71_v0  ;;  %v72_v7 = vld [vmem:[%s233_s1] sm:$0xff]  ;;  %v73_v9 = vmax.f32 %v71_v0, 0.0 }
  0x16   :  { %v74_v10 = vmul.f32 %v72_v7, %v71_v0  ;;  %v99_v17 = vand.u32 127, %v98_v12  ;;  %v156_v19 = vld [vmem:[%s234_s2] ss:$0 sm:$0xff] }
  0x17   :  { %v77_v2 = vsub.f32 0.0, %v76_v1 }
  0x18   :  { %v75_v15 = vsub.f32 %v73_v9, %v74_v10  ;;  %vm104_vm1 = vcmp.lt.s32.totalorder %v99_v17, 32 }
  0x19   :  { %v78_v3 = vmul.f32 1.442695, %v77_v2 }
  0x1b   :  { %160 = vpow2.f32 %v78_v3 }
  0x25   :  { %v161_v4 = vpop.eup %160 }
  0x26   :  { %v80_v5 = vadd.f32 1.0, %v161_v4  ;;  %v83_v6 = vmul.f32 -0.5, %v161_v4  ;;  %v86_v11 = vand.u32 2147483647, %v161_v4 }
  0x28   :  { %162 = vlog2.f32 %v80_v5  ;;  %v84_v8 = vadd.f32 1.0, %v83_v6  ;;  %vm87_vm0 = vcmp.lt.f32.partialorder %v86_v11, 0.0004427343 }
  0x2a   :  { %v85_v13 = vmul.f32 %v161_v4, %v84_v8 }
  0x32   :  { %v163_v14 = vpop.eup %162 }
  0x33   :  { %v82_v16 = vmul.f32 0.6931472, %v163_v14 }
  0x35   :  { %v88_v18 = vsel %vm87_vm0, %v85_v13, %v82_v16 }
  0x36   :  { %v89_v20 = vadd.f32 %v88_v18, %v75_v15 }
  0x38   :  { %v97_v21 = vmul.f32 %v156_v19, %v89_v20 }
  0x3a   :  { %v107_v22 = vsel %vm104_vm1, %v97_v21, 0.0 }
  0x3b   :  { %111 = vadd.xlane.f32.xlu0 %v107_v22 }
  0xc8   :  { %v112_v23 = vpop.xlane.xlu0 %111 }
  0xc9   :  { %114 = vst.msk [vmem:[#allocation5] sm:$0xff] %vm113_vm2, %v112_v23 }
  0xd0   :  { %v132_v24 = vld [vmem:[#allocation5] sm:$0x3] }
  0xd1   :  { %133 = vst [vmem:[%s235_s3] sm:$0x3] %v132_v24 }
  0xd2   :  { %150 = vsyncpa [#allocation4], 1 }

</bundles_post_ra>
